<compile_context>
chip_gen: v7x
topology: tpu7x:2x2x1
jax: 0.10.0
libtpu: 0.0.40
codegen_flags: <defaults>
</compile_context>

<pallas_src>
import functools
import math

import jax
import jax.numpy as jnp
from jax.experimental import pallas as pl
from jax.experimental.pallas import tpu as pltpu


_VMEM_LIMIT = 48 << 20          # leave headroom under v7x's 64 MiB physical VMEM
_WS_BUDGET = 40 << 20           # VMEM budget for the weight-stationary path


def _round_up(a, b):
    return ((a + b - 1) // b) * b


def _cdiv(a, b):
    return -(-a // b)


def _normalize(x, g, beta, eps, rms_norm, out_dtype):
    """LayerNorm / RMSNorm of a row tile, math in f32, result in out_dtype."""
    xf = x.astype(jnp.float32)
    gf = g.astype(jnp.float32)
    if rms_norm:
        # PyTorch RMSNorm: normalize in f32, cast back to the input dtype
        # BEFORE multiplying by the weight.
        inv = jax.lax.rsqrt(jnp.mean(xf * xf, axis=-1, keepdims=True) + eps)
        xn = (xf * inv).astype(out_dtype).astype(jnp.float32) * gf
    else:
        mu = jnp.mean(xf, axis=-1, keepdims=True)
        xc = xf - mu
        var = jnp.mean(xc * xc, axis=-1, keepdims=True)
        xn = xc * jax.lax.rsqrt(var + eps) * gf + beta.astype(jnp.float32)
    return xn.astype(out_dtype)


def _swish(h):
    # h is f32. exp and the approximate reciprocal both go to the EUP slot,
    # overlapping the MXU instead of burning VALU slots (sigmoid's lowering
    # is select-heavy).
    return h * pl.reciprocal(1.0 + jnp.exp(-h), approx=True)


# --------------------------------------------------------------------------
# Kernel A: weight-stationary (W1/W2 resident in VMEM, grid over row tiles).
# --------------------------------------------------------------------------
def _ffn_kernel_ws(x_ref, g_ref, beta_ref, w1_ref, b1_ref, w2_ref, b2_ref,
                   o_ref, *, eps, rms_norm):
    xn = _normalize(x_ref[...], g_ref[...], beta_ref[...], eps, rms_norm,
                    w1_ref.dtype)
    # MXU matmuls in the native (activation) dtype, f32 accumulation.
    h = jnp.dot(xn, w1_ref[...], preferred_element_type=jnp.float32)
    h = _swish(h + b1_ref[...].astype(jnp.float32))
    # TODO(synk): dropout1 / dropout2 are identity here (inference / eval mode).
    out = jnp.dot(h.astype(w2_ref.dtype), w2_ref[...],
                  preferred_element_type=jnp.float32)
    o_ref[...] = (out + b2_ref[...].astype(jnp.float32)).astype(o_ref.dtype)


# --------------------------------------------------------------------------
# Kernel B: d_ff-tiled fallback (reduction over d_ff tiles on axis 1).
# --------------------------------------------------------------------------
def _ffn_kernel_tiled(x_ref, g_ref, beta_ref, w1_ref, b1_ref, w2_ref, b2_ref,
                      o_ref, xn_ref, acc_ref, *, eps, rms_norm):
    j = pl.program_id(1)
    jlast = pl.num_programs(1) - 1

    @pl.when(j == 0)
    def _():
        xn_ref[...] = _normalize(x_ref[...], g_ref[...], beta_ref[...],
                                 eps, rms_norm, xn_ref.dtype)
        acc_ref[...] = jnp.zeros_like(acc_ref)

    # h = swish(xn @ W1_tile + b1_tile)   (native-dtype MXU matmul, f32 acc)
    h = jnp.dot(xn_ref[...], w1_ref[...], preferred_element_type=jnp.float32)
    h = _swish(h + b1_ref[...].astype(jnp.float32))
    # TODO(synk): dropout1 / dropout2 are identity here (inference / eval mode).

    partial = jnp.dot(h.astype(w2_ref.dtype), w2_ref[...],
                      preferred_element_type=jnp.float32)

    @pl.when(j < jlast)
    def _():
        acc_ref[...] += partial

    @pl.when(j == jlast)
    def _():
        # Fold the b2 add into the last reduction step (no extra finalize RMW).
        o_ref[...] = (acc_ref[...] + partial
                      + b2_ref[...].astype(jnp.float32)).astype(o_ref.dtype)


def feed_forward_conformer(x, gamma, beta, w1, b1, w2, b2, *,
                           eps=1e-5, rms_norm=False,
                           row_tile=512, ff_tile=512,
                           weight_stationary=None):
    """Fused Norm -> Linear1 -> Swish -> Linear2 (dropout = identity)."""
    orig_shape = x.shape
    d_model = orig_shape[-1]
    d_ff = w1.shape[1]
    assert w1.shape == (d_model, d_ff)
    assert w2.shape == (d_ff, d_model)
    assert gamma.shape == (d_model,) and beta.shape == (d_model,)
    assert b1.shape == (d_ff,) and b2.shape == (d_model,)

    compute_dtype = x.dtype
    # Feed the MXU in the activation dtype (bf16 x bf16 -> f32 fast path).
    w1 = w1.astype(compute_dtype)
    w2 = w2.astype(compute_dtype)

    # Flatten leading dims into rows; d_model stays on the lane axis.
    x2d = x.reshape(-1, d_model)
    rows = x2d.shape[0]

    # --- row tile: large (amortize per-step overhead), multiple of sublane pack.
    pack = 16 if compute_dtype == jnp.bfloat16 else 8
    tm = min(row_tile, _round_up(rows, pack))
    tm = _round_up(tm, pack)
    # Megacore: make sure the "parallel" row axis has >= 2 tiles when possible
    # (v7x has 2 TensorCores per chip).
    if rows > pack and _cdiv(rows, tm) < 2:
        tm = _round_up(_cdiv(rows, 2), pack)
    rows_p = _round_up(rows, tm)
    if rows_p != rows:
        # Zero-padding is safe: padded rows are sliced off at the end.
        x2d = jnp.pad(x2d, ((0, rows_p - rows), (0, 0)))
    n_row_tiles = rows_p // tm

    # --- choose weight-stationary vs d_ff-tiled.
    itm = jnp.dtype(compute_dtype).itemsize
    if weight_stationary is None:
        vmem_need = (2 * d_model * d_ff * itm          # resident W1 + W2
                     + 2 * 2 * tm * d_model * itm      # double-buffered x / out tiles
                     + tm * d_ff * 4                   # h (f32) intermediate
                     + 2 * tm * d_model * 4            # xn / out f32 temporaries
                     + (d_ff + 3 * d_model) * itm)     # biases, gamma, beta
        weight_stationary = vmem_need <= _WS_BUDGET

    g2d = gamma.reshape(1, d_model)
    be2d = beta.reshape(1, d_model)
    b2_2d = b2.reshape(1, d_model)

    if weight_stationary:
        kernel = functools.partial(_ffn_kernel_ws, eps=eps, rms_norm=rms_norm)
        out2d = pl.pallas_call(
            kernel,
            out_shape=jax.ShapeDtypeStruct((rows_p, d_model), compute_dtype),
            grid_spec=pltpu.PrefetchScalarGridSpec(
                num_scalar_prefetch=0,
                grid=(n_row_tiles,),
                in_specs=[
                    pl.BlockSpec((tm, d_model), lambda i: (i, 0)),      # x
                    pl.BlockSpec((1, d_model), lambda i: (0, 0)),       # gamma
                    pl.BlockSpec((1, d_model), lambda i: (0, 0)),       # beta
                    # Constant index maps -> W1/W2/b1 are DMA'd once and stay
                    # resident in VMEM across all row tiles.
                    pl.BlockSpec((d_model, d_ff), lambda i: (0, 0)),    # w1
                    pl.BlockSpec((1, d_ff), lambda i: (0, 0)),          # b1
                    pl.BlockSpec((d_ff, d_model), lambda i: (0, 0)),    # w2
                    pl.BlockSpec((1, d_model), lambda i: (0, 0)),       # b2
                ],
                out_specs=pl.BlockSpec((tm, d_model), lambda i: (i, 0)),
            ),
            compiler_params=pltpu.CompilerParams(
                dimension_semantics=("parallel",),
                vmem_limit_bytes=_VMEM_LIMIT,
            ),
        )(x2d, g2d, be2d, w1, b1.reshape(1, d_ff), w2, b2_2d)
    else:
        # --- d_ff tile: 128-aligned; pad d_ff up to a multiple of it.
        tf = _round_up(min(ff_tile, _round_up(d_ff, 128)), 128)
        d_ff_p = _round_up(d_ff, tf)
        if d_ff_p != d_ff:
            # Zero padding is exact: padded hidden units give swish(0)=0 and the
            # padded W2 rows are zero, so they contribute nothing to the output.
            w1 = jnp.pad(w1, ((0, 0), (0, d_ff_p - d_ff)))
            b1 = jnp.pad(b1, ((0, d_ff_p - d_ff),))
            w2 = jnp.pad(w2, ((0, d_ff_p - d_ff), (0, 0)))

        grid = (n_row_tiles, d_ff_p // tf)
        kernel = functools.partial(_ffn_kernel_tiled, eps=eps, rms_norm=rms_norm)
        out2d = pl.pallas_call(
            kernel,
            out_shape=jax.ShapeDtypeStruct((rows_p, d_model), compute_dtype),
            grid_spec=pltpu.PrefetchScalarGridSpec(
                num_scalar_prefetch=0,
                grid=grid,
                in_specs=[
                    pl.BlockSpec((tm, d_model), lambda i, j: (i, 0)),   # x
                    pl.BlockSpec((1, d_model), lambda i, j: (0, 0)),    # gamma
                    pl.BlockSpec((1, d_model), lambda i, j: (0, 0)),    # beta
                    pl.BlockSpec((d_model, tf), lambda i, j: (0, j)),   # w1
                    pl.BlockSpec((1, tf), lambda i, j: (0, j)),         # b1
                    pl.BlockSpec((tf, d_model), lambda i, j: (j, 0)),   # w2
                    pl.BlockSpec((1, d_model), lambda i, j: (0, 0)),    # b2
                ],
                out_specs=pl.BlockSpec((tm, d_model), lambda i, j: (i, 0)),
                scratch_shapes=[
                    pltpu.VMEM((tm, d_model), compute_dtype),  # cached normalized tile
                    pltpu.VMEM((tm, d_model), jnp.float32),    # f32 accumulator
                ],
            ),
            compiler_params=pltpu.CompilerParams(
                dimension_semantics=("parallel", "arbitrary"),
                vmem_limit_bytes=_VMEM_LIMIT,
            ),
        )(x2d, g2d, be2d, w1, b1.reshape(1, d_ff_p), w2, b2_2d)

    return out2d[:rows].reshape(orig_shape)


def ffn_ref(x, gamma, beta, w1, b1, w2, b2, *, eps, rms_norm):
    xf = x.astype(jnp.float32)
    if rms_norm:
        inv = jax.lax.rsqrt(jnp.mean(xf * xf, axis=-1, keepdims=True) + eps)
        xn = (xf * inv).astype(x.dtype).astype(jnp.float32) * gamma
    else:
        mu = jnp.mean(xf, axis=-1, keepdims=True)
        var = jnp.mean((xf - mu) ** 2, axis=-1, keepdims=True)
        xn = (xf - mu) * jax.lax.rsqrt(var + eps) * gamma + beta
    h = xn @ w1.astype(jnp.float32) + b1
    h = h * jax.nn.sigmoid(h)
    y = h @ w2.astype(jnp.float32) + b2
    return y.astype(x.dtype)


if __name__ == "__main__":
    key = jax.random.PRNGKey(0)
    batch, seq, d_model, d_ff = 2, 8, 32, 64
    k = jax.random.split(key, 5)

    x = jax.random.normal(k[0], (batch, seq, d_model), dtype=jnp.float32)
    # Parameter init matching the PyTorch module (LayerNorm/RMSNorm weights).
    gamma = jnp.ones((d_model,), jnp.float32)
    beta = jnp.zeros((d_model,), jnp.float32)
    lim1 = 1.0 / math.sqrt(d_model)
    w1 = jax.random.uniform(k[1], (d_model, d_ff), jnp.float32, -lim1, lim1)
    b1 = jax.random.uniform(k[2], (d_ff,), jnp.float32, -lim1, lim1)
    lim2 = 1.0 / math.sqrt(d_ff)
    w2 = jax.random.uniform(k[3], (d_ff, d_model), jnp.float32, -lim2, lim2)
    b2 = jax.random.uniform(k[4], (d_model,), jnp.float32, -lim2, lim2)

    # Tolerances are slightly relaxed because swish uses the EUP approximate
    # reciprocal inside the kernel.
    tol = dict(atol=5e-3, rtol=5e-3)

    # Default module config: LayerNorm (rms_norm=False), eps=1e-5.
    ref = ffn_ref(x, gamma, beta, w1, b1, w2, b2, eps=1e-5, rms_norm=False)

    # Weight-stationary path (auto-selected for these sizes).
    out_ws = feed_forward_conformer(x, gamma, beta, w1, b1, w2, b2,
                                    eps=1e-5, rms_norm=False)
    out_ws = jax.block_until_ready(out_ws)
    assert out_ws.shape == x.shape and out_ws.dtype == x.dtype
    assert jnp.allclose(out_ws, ref, **tol)

    # Forced d_ff-tiled path (exercises d_ff padding + reduction accumulator).
    out_t = feed_forward_conformer(x, gamma, beta, w1, b1, w2, b2,
                                   eps=1e-5, rms_norm=False,
                                   weight_stationary=False)
    out_t = jax.block_until_ready(out_t)
    assert jnp.allclose(out_t, ref, **tol)

    # rms_norm=True variant (eps=1e-6 as in the RMSNorm module).
    ref_rms = ffn_ref(x, gamma, beta, w1, b1, w2, b2, eps=1e-6, rms_norm=True)
    out_rms = feed_forward_conformer(x, gamma, beta, w1, b1, w2, b2,
                                     eps=1e-6, rms_norm=True)
    out_rms = jax.block_until_ready(out_rms)
    assert jnp.allclose(out_rms, ref_rms, **tol)
    out_rms_t = feed_forward_conformer(x, gamma, beta, w1, b1, w2, b2,
                                       eps=1e-6, rms_norm=True,
                                       weight_stationary=False)
    out_rms_t = jax.block_until_ready(out_rms_t)
    assert jnp.allclose(out_rms_t, ref_rms, **tol)

    # bf16 smoke test: exercises the native bf16 MXU path (no strict compare).
    out_bf16 = feed_forward_conformer(
        x.astype(jnp.bfloat16), gamma, beta, w1, b1, w2, b2,
        eps=1e-5, rms_norm=False)
    out_bf16 = jax.block_until_ready(out_bf16)
    assert out_bf16.dtype == jnp.bfloat16
    assert bool(jnp.isfinite(out_bf16.astype(jnp.float32)).all())

    print("KERNEL_OK")
</pallas_src>

<mosaic_0001>
module attributes {stable_mosaic.version = 11 : i64} {
  func.func @_ffn_kernel_ws(%arg0: i32, %arg1: memref<8x32xf32, #tpu.memory_space<vmem>>, %arg2: memref<1x32xf32, #tpu.memory_space<vmem>>, %arg3: memref<1x32xf32, #tpu.memory_space<vmem>>, %arg4: memref<32x64xf32, #tpu.memory_space<vmem>>, %arg5: memref<1x64xf32, #tpu.memory_space<vmem>>, %arg6: memref<64x32xf32, #tpu.memory_space<vmem>>, %arg7: memref<1x32xf32, #tpu.memory_space<vmem>>, %arg8: memref<8x32xf32, #tpu.memory_space<vmem>>) attributes {dimension_semantics = [#tpu.dimension_semantics<parallel>], iteration_bounds = array<i64: 2>, scalar_prefetch = 0 : i64, scratch_operands = 0 : i64, tpu.core_type = #tpu.core_type<tc>, window_params = [{transform_indices = @transform_0, window_bounds = array<i64: 8, 32>}, {pipeline_mode = #tpu.pipeline_mode<synchronous>, transform_indices = @transform_1, window_bounds = array<i64: 1, 32>}, {pipeline_mode = #tpu.pipeline_mode<synchronous>, transform_indices = @transform_2, window_bounds = array<i64: 1, 32>}, {pipeline_mode = #tpu.pipeline_mode<synchronous>, transform_indices = @transform_3, window_bounds = array<i64: 32, 64>}, {pipeline_mode = #tpu.pipeline_mode<synchronous>, transform_indices = @transform_4, window_bounds = array<i64: 1, 64>}, {pipeline_mode = #tpu.pipeline_mode<synchronous>, transform_indices = @transform_5, window_bounds = array<i64: 64, 32>}, {pipeline_mode = #tpu.pipeline_mode<synchronous>, transform_indices = @transform_6, window_bounds = array<i64: 1, 32>}, {transform_indices = @transform_7, window_bounds = array<i64: 8, 32>}]} {
    %c0 = arith.constant 0 : index
    %c0_0 = arith.constant 0 : index
    %0 = vector.load %arg1[%c0, %c0_0] : memref<8x32xf32, #tpu.memory_space<vmem>>, vector<8x32xf32>
    %c0_1 = arith.constant 0 : index
    %c0_2 = arith.constant 0 : index
    %1 = vector.load %arg2[%c0_1, %c0_2] : memref<1x32xf32, #tpu.memory_space<vmem>>, vector<1x32xf32>
    %c0_3 = arith.constant 0 : index
    %c0_4 = arith.constant 0 : index
    %2 = vector.load %arg3[%c0_3, %c0_4] : memref<1x32xf32, #tpu.memory_space<vmem>>, vector<1x32xf32>
    %cst = arith.constant dense<0.000000e+00> : vector<8xf32>
    %3 = vector.multi_reduction <add>, %0, %cst [1] : vector<8x32xf32> to vector<8xf32>
    %4 = vector.shape_cast %3 : vector<8xf32> to vector<8x1xf32>
    %cst_5 = arith.constant 3.200000e+01 : f32
    %5 = vector.broadcast %cst_5 : f32 to vector<8x1xf32>
    %6 = arith.divf %4, %5 : vector<8x1xf32>
    %7 = vector.broadcast %6 : vector<8x1xf32> to vector<8x32xf32>
    %8 = arith.subf %0, %7 : vector<8x32xf32>
    %9 = arith.mulf %8, %8 : vector<8x32xf32>
    %cst_6 = arith.constant dense<0.000000e+00> : vector<8xf32>
    %10 = vector.multi_reduction <add>, %9, %cst_6 [1] : vector<8x32xf32> to vector<8xf32>
    %11 = vector.shape_cast %10 : vector<8xf32> to vector<8x1xf32>
    %cst_7 = arith.constant 3.200000e+01 : f32
    %12 = vector.broadcast %cst_7 : f32 to vector<8x1xf32>
    %13 = arith.divf %11, %12 : vector<8x1xf32>
    %cst_8 = arith.constant 9.99999974E-6 : f32
    %14 = vector.broadcast %cst_8 : f32 to vector<8x1xf32>
    %15 = arith.addf %13, %14 : vector<8x1xf32>
    %16 = math.rsqrt %15 : vector<8x1xf32>
    %17 = vector.broadcast %16 : vector<8x1xf32> to vector<8x32xf32>
    %18 = arith.mulf %8, %17 : vector<8x32xf32>
    %19 = vector.broadcast %1 : vector<1x32xf32> to vector<8x32xf32>
    %20 = arith.mulf %18, %19 : vector<8x32xf32>
    %21 = vector.broadcast %2 : vector<1x32xf32> to vector<8x32xf32>
    %22 = arith.addf %20, %21 : vector<8x32xf32>
    %c0_9 = arith.constant 0 : index
    %c0_10 = arith.constant 0 : index
    %23 = vector.load %arg4[%c0_9, %c0_10] : memref<32x64xf32, #tpu.memory_space<vmem>>, vector<32x64xf32>
    %cst_11 = arith.constant dense<0.000000e+00> : vector<8x64xf32>
    %24 = tpu.matmul %22, %23, %cst_11 {dimension_numbers = #tpu.dot_dimension_numbers<[1], [0], [0], [1], [0, 0, 1, 1], [], []>} : vector<8x32xf32>, vector<32x64xf32>, vector<8x64xf32> -> vector<8x64xf32>
    %c0_12 = arith.constant 0 : index
    %c0_13 = arith.constant 0 : index
    %25 = vector.load %arg5[%c0_12, %c0_13] : memref<1x64xf32, #tpu.memory_space<vmem>>, vector<1x64xf32>
    %26 = vector.broadcast %25 : vector<1x64xf32> to vector<8x64xf32>
    %27 = arith.addf %24, %26 : vector<8x64xf32>
    %cst_14 = arith.constant 0.000000e+00 : f32
    %28 = vector.broadcast %cst_14 : f32 to vector<8x64xf32>
    %29 = arith.subf %28, %27 : vector<8x64xf32>
    %30 = math.exp %29 : vector<8x64xf32>
    %cst_15 = arith.constant 1.000000e+00 : f32
    %31 = vector.broadcast %cst_15 : f32 to vector<8x64xf32>
    %32 = arith.addf %31, %30 : vector<8x64xf32>
    %33 = tpu.reciprocal %32 {approx = true} : vector<8x64xf32> -> vector<8x64xf32>
    %34 = arith.mulf %27, %33 : vector<8x64xf32>
    %c0_16 = arith.constant 0 : index
    %c0_17 = arith.constant 0 : index
    %35 = vector.load %arg6[%c0_16, %c0_17] : memref<64x32xf32, #tpu.memory_space<vmem>>, vector<64x32xf32>
    %cst_18 = arith.constant dense<0.000000e+00> : vector<8x32xf32>
    %36 = tpu.matmul %34, %35, %cst_18 {dimension_numbers = #tpu.dot_dimension_numbers<[1], [0], [0], [1], [0, 0, 1, 1], [], []>} : vector<8x64xf32>, vector<64x32xf32>, vector<8x32xf32> -> vector<8x32xf32>
    %c0_19 = arith.constant 0 : index
    %c0_20 = arith.constant 0 : index
    %37 = vector.load %arg7[%c0_19, %c0_20] : memref<1x32xf32, #tpu.memory_space<vmem>>, vector<1x32xf32>
    %38 = vector.broadcast %37 : vector<1x32xf32> to vector<8x32xf32>
    %39 = arith.addf %36, %38 : vector<8x32xf32>
    %c0_21 = arith.constant 0 : index
    %c0_22 = arith.constant 0 : index
    %40 = vector.load %arg8[%c0_21, %c0_22] : memref<8x32xf32, #tpu.memory_space<vmem>>, vector<8x32xf32>
    tpu.vector_store %arg8[%c0_21, %c0_22], %39 {strides = array<i32>} : memref<8x32xf32, #tpu.memory_space<vmem>>, vector<8x32xf32>,
    return
  }
  func.func @transform_0(%arg0: i32) -> (i32, i32) {
    %c0_i32 = arith.constant 0 : i32
    %c0_i32_0 = arith.constant 0 : i32
    return %arg0, %c0_i32 : i32, i32
  }
  func.func @transform_1(%arg0: i32) -> (i32, i32) {
    %c0_i32 = arith.constant 0 : i32
    %c0_i32_0 = arith.constant 0 : i32
    %c0_i32_1 = arith.constant 0 : i32
    return %c0_i32, %c0_i32_0 : i32, i32
  }
  func.func @transform_2(%arg0: i32) -> (i32, i32) {
    %c0_i32 = arith.constant 0 : i32
    %c0_i32_0 = arith.constant 0 : i32
    %c0_i32_1 = arith.constant 0 : i32
    return %c0_i32, %c0_i32_0 : i32, i32
  }
  func.func @transform_3(%arg0: i32) -> (i32, i32) {
    %c0_i32 = arith.constant 0 : i32
    %c0_i32_0 = arith.constant 0 : i32
    %c0_i32_1 = arith.constant 0 : i32
    return %c0_i32, %c0_i32_0 : i32, i32
  }
  func.func @transform_4(%arg0: i32) -> (i32, i32) {
    %c0_i32 = arith.constant 0 : i32
    %c0_i32_0 = arith.constant 0 : i32
    %c0_i32_1 = arith.constant 0 : i32
    return %c0_i32, %c0_i32_0 : i32, i32
  }
  func.func @transform_5(%arg0: i32) -> (i32, i32) {
    %c0_i32 = arith.constant 0 : i32
    %c0_i32_0 = arith.constant 0 : i32
    %c0_i32_1 = arith.constant 0 : i32
    return %c0_i32, %c0_i32_0 : i32, i32
  }
  func.func @transform_6(%arg0: i32) -> (i32, i32) {
    %c0_i32 = arith.constant 0 : i32
    %c0_i32_0 = arith.constant 0 : i32
    %c0_i32_1 = arith.constant 0 : i32
    return %c0_i32, %c0_i32_0 : i32, i32
  }
  func.func @transform_7(%arg0: i32) -> (i32, i32) {
    %c0_i32 = arith.constant 0 : i32
    %c0_i32_0 = arith.constant 0 : i32
    return %arg0, %c0_i32 : i32, i32
  }
}

</mosaic_0001>

<bundles_post_ra>
// kernel: tpu_custom_call.1
= control target key start
LH: loop header
LB: loop body
LE: loop exit
PB: predicated region body
PF: predicated region fallthrough
CT: control target
= control target key end

     0   :  { %12 = vsyncpa [#allocation3], 0  ;;  %s945_s0 = inlined_call_operand.vmem [shape: f32[16,32], index: 0, kind: input, shape index: {}]   ;;  %s946_s1 = inlined_call_operand.vmem [shape: f32[1,32], index: 1, kind: input, shape index: {}]   ;;  %s947_s2 = inlined_call_operand.vmem [shape: f32[1,32], index: 2, kind: input, shape index: {}]   ;;  %s948_s3 = inlined_call_operand.vmem [shape: f32[32,64], index: 3, kind: input, shape index: {}]   ;;  %s949_s4 = inlined_call_operand.vmem [shape: f32[1,64], index: 4, kind: input, shape index: {}]   ;;  %s950_s5 = inlined_call_operand.vmem [shape: f32[64,32], index: 5, kind: input, shape index: {}]   ;;  %s951_s6 = inlined_call_operand.vmem [shape: f32[1,32], index: 6, kind: input, shape index: {}]   ;;  %s952_s7 = inlined_call_operand.hbm [shape: f32[16,32], index: 7, kind: output, shape index: {}]  }
   0x1   :  { %14 = vsyncpa [#allocation3 + $0x1], 0  ;;  %s793_s24 = smov 0   ;;  %s795_s25 = smov 0  }
   0x2   :  { %s797_s26 = smov 0   ;;  %s799_s27 = smov 0  }
   0x3 LB: > { %s814_s28 = sadd.s32 4294967295, %s747_s27   ;;  %s559_s29 = sadd.s32 4294967294, %s747_s27   ;;  %s747_s27 = sphi %s799_s27, %s958_s27   ;;  %s743_s26 = sphi %s797_s26, %s957_s26   ;;  %s739_s25 = sphi %s795_s25, %s956_s25   ;;  %s735_s24 = sphi %s793_s24, %s955_s24  }
   0x4   : > { %s818_s30 = sadd.s32 1, %s747_s27   ;;  %s179_s8 = sadd.s32 1, %s743_s26 }
   0x5   : > { %s176_s9 = ssub.s32 %s747_s27, %s818_s30  ;;  %p189_p0 = scmp.ne.s32.totalorder %s743_s26, %s739_s25 }
   0x6   : > { %p177_p1 = scmp.eq.s32.totalorder %s176_s9, 0  ;;  %p190_p2 = scmp.eq.s32.totalorder %s814_s28, 1 }
   0x7   : > { %p195_p3 = scmp.ne.s32.totalorder %s739_s25, %s735_s24  ;;  %p196_p4 = scmp.eq.s32.totalorder %s559_s29, 1 }
   0x8   : > { %s829_s10 = scalar_select %p177_p1, %s743_s26, %s179_s8  }
   0x9   : > { %p831_p5 = por %p190_p2, %p189_p0  ;;  %p835_p6 = por %p196_p4, %p195_p3 }
   0xa   : > { %p562_p7 = scmp.ge.s32.totalorder %s747_s27, 1  ;;  %p239_p8 = scmp.lt.s32.totalorder %s747_s27, 3 }
   0xc   : > { %p240_p9 = pnand %p562_p7, %p239_p8 }
   0xd   : > { %p270_p10 = scmp.lt.s32.totalorder (!%p240_p9), %s814_s28, 1  ;;  %vm277_vm0 = vcmask (!%p240_p9), 261120   ;;  %v306_v7 = vld [vmem:[%s948_s3] sm:$0xff] (!%p240_p9)  ;;  %v307_v8 = vld [vmem:[%s948_s3 + $0x8] sm:$0xff] (!%p240_p9)  ;;  %v308_v9 = vld [vmem:[%s948_s3 + $0x10] sm:$0xff] (!%p240_p9)  ;;  %v749_v10 = vmov (!%p240_p9), 0.0|0.0  }
   0xe   : > { %243 = sbr.rel (%p240_p9) target bundleno = 811 (0x32b), region = 48  ;;  %619 = vmatprep.subr.bf16.mxu0 (!%p240_p9), %v749_v10  ;;  %v620_v11 = vpack.c.bf16 (!%p240_p9), %v307_v8, %v306_v7  ;;  %v309_v12 = vld [vmem:[%s948_s3 + $0x18] sm:$0xff] (!%p240_p9)  ;;  %vm750_vm1 = vmmov (!%p240_p9), 0   ;;  %v751_v13 = vmov (!%p240_p9), 0.0   ;;  %625 = vmatprep.subr.bf16.mxu1 (!%p240_p9), %v749_v10  ;;  %v565_v19 = vld [vmem:[%s946_s1] ss:$0 sm:$0xff] (!%p240_p9) }
   0xf   : > { %597 = vmatprep.mubr.msk.f32.mxu0 (!%p240_p9), %vm750_vm1, %v751_v13  ;;  %616 = vmatprep.mubr.msk.f32.mxu1 (!%p240_p9), %vm750_vm1, %v751_v13  ;;  %v623_v14 = vpack.c.bf16 (!%p240_p9), %v309_v12, %v308_v9  ;;  %v566_v21 = vld [vmem:[%s947_s2] ss:$0 sm:$0xff] (!%p240_p9)  ;;  %v397_v25 = vld [vmem:[%s950_s5 + $0x8] sm:$0xff] (!%p240_p9)  ;;  %v398_v27 = vld [vmem:[%s950_s5 + $0x10] sm:$0xff] (!%p240_p9)  ;;  %vm411_vm2 = vcmask (!%p240_p9), 523264   ;;  %s267_s20 = sand.u32 (!%p240_p9), 1, %s739_s25  }
  0x10   : > { %621 = vmatpush3.bf16.msra.mxu0 (!%p240_p9), %v620_v11  ;;  %v396_v24 = vld [vmem:[%s950_s5] sm:$0xff] (!%p240_p9)  ;;  %v399_v28 = vld [vmem:[%s950_s5 + $0x18] sm:$0xff] (!%p240_p9)  ;;  %v401_v31 = vld [vmem:[%s950_s5 + $0x28] sm:$0xff] (!%p240_p9)  ;;  %s563_s21 = sshll.u32 (!%p240_p9), %s267_s20, 3  ;;  %s572_s29 = sshll.u32 (!%p240_p9), %s814_s28, 7 }
  0x11   : > { %622 = vmatprep.subr.bf16.mxu0 (!%p240_p9), %v749_v10  ;;  %v626_v26 = vpack.c.bf16 (!%p240_p9), %v397_v25, %v396_v24  ;;  %v629_v29 = vpack.c.bf16 (!%p240_p9), %v399_v28, %v398_v27  ;;  %v400_v30 = vld [vmem:[%s950_s5 + $0x20] sm:$0xff] (!%p240_p9)  ;;  %v402_v33 = vld [vmem:[%s950_s5 + $0x30] sm:$0xff] (!%p240_p9)  ;;  %v403_v34 = vld [vmem:[%s950_s5 + $0x38] sm:$0xff] (!%p240_p9)  ;;  %s269_s8 = scalar_lea.vmem (!%p240_p9), [#allocation2], %s563_s21  ;;  %s902_s15 = scalar_lea.hbm (!%p240_p9), %s952_s7, %s572_s29 }
  0x12   : > { %v632_v32 = vpack.c.bf16 (!%p240_p9), %v401_v31, %v400_v30  ;;  %v635_v35 = vpack.c.bf16 (!%p240_p9), %v403_v34, %v402_v33  ;;  %v567_v36 = vld [vmem:[%s949_s4] ss:$0 sm:$0xff] (!%p240_p9)  ;;  %s500_s9 = sshll.u32 (!%p240_p9), %s269_s8, 4  ;;  %s487_s16 = scalar_lea.sflag (!%p240_p9), [#allocation3], %s267_s20  ;;  %s904_s9 = int_to_ptr.vmem [resolvable:$true] %s500_s9 }
  0x13   : > { %627 = vmatpush3.bf16.msra.mxu1 (!%p240_p9), %v626_v26  ;;  %v569_v46 = vld [vmem:[%s951_s6] ss:$0 sm:$0xff] (!%p240_p9) }
  0x14   : > { %624 = vmatpush3.bf16.msra.mxu0 (!%p240_p9), %v623_v14  ;;  %628 = vmatprep.subr.bf16.mxu1 (!%p240_p9), %v749_v10 }
  0x15   : > { %s271_s13 = scalar_select %p270_p10, %s814_s28, 1 }
  0x16   : > { %s752_s28 = smov [#allocation2]  }
  0x17   : > { %s564_s14 = sshll.u32 %s271_s13, 3  ;;  %630 = vmatpush3.bf16.msra.mxu1 %v629_v29  ;;  %s689_s18 = sshll.u32 %s752_s28, 4  ;;  %s690_s18 = int_to_ptr.vmem [resolvable:$false] %s689_s18 }
  0x18   : > { %s273_s17 = scalar_lea.vmem %s945_s0, %s564_s14  ;;  %631 = vmatprep.subr.bf16.mxu1 %v749_v10  ;;  %s691_s19 = scalar_lea.vmem %s690_s18, 256 }
  0x19   : > { %v274_v0 = vld [vmem:[%s273_s17] sm:$0xff]  ;;  %s685_s17 = scalar_lea.vmem %s904_s9, 128  ;;  %p692_p0 = scmp.lt.s32.totalorder %s904_s9, %s690_s18 }
  0x1a   : > { %v278_v1 = vsel %vm277_vm0, %v274_v0, 0.0  ;;  %p686_p11 = scmp.ne.s32.totalorder %s904_s9, %s685_s17  ;;  %p693_p1 = scmp.lt.s32.totalorder %s691_s19, %s685_s17 }
  0x1b   : > { %279 = vadd.xlane.f32.xlu0 %v278_v1  ;;  %633 = vmatpush3.bf16.msra.mxu1 %v632_v32 }
  0x1c   : > { %634 = vmatprep.subr.bf16.mxu1 %v749_v10  ;;  %p687_p12 = pnand %p686_p11, %p831_p5  ;;  %p694_p2 = por %p693_p1, %p692_p0 }
  0x1e   : > { %p688_p13 = pneg %p687_p12 }
  0x1f   : > { %636 = vmatpush3.bf16.msra.mxu1 %v635_v35 }
  0x20   : > { %p695_p3 = pnand %p694_p2, %p688_p13 }
  0xa8   : > { %v280_v2 = vpop.xlane.xlu0 %279 }
  0xa9   : > { %v282_v3 = vmul.f32 0.03125, %v280_v2 }
  0xab   : > { %v283_v4 = vsub.f32 %v274_v0, %v282_v3 }
  0xad   : > { %v284_v5 = vmul.f32 %v283_v4, %v283_v4 }
  0xaf   : > { %v285_v6 = vsel %vm277_vm0, %v284_v5, 0.0 }
  0xb0   : > { %286 = vadd.xlane.f32.xlu0 %v285_v6 }
 0x13d   : > { %v287_v15 = vpop.xlane.xlu0 %286 }
 0x13e   : > { %v288_v16 = vmul.f32 0.03125, %v287_v15 }
 0x140   : > { %v289_v17 = vadd.f32 1e-05, %v288_v16 }
 0x142   : > { %679 = vrsqrt.f32 %v289_v17 }
 0x14c   : > { %v680_v18 = vpop.eup %679 }
 0x14d   : > { %v291_v20 = vmul.f32 %v680_v18, %v283_v4 }
 0x14f   : > { %v298_v22 = vmul.f32 %v565_v19, %v291_v20 }
 0x151   : > { %v305_v23 = vadd.f32 %v566_v21, %v298_v22 }
 0x153   : > { %598 = vmatmul.mubr.msk.f32.vlgmr.msra.gmra.mrb[0].mxu0 %vm277_vm0, %v305_v23 }
 0x226   : > { %v386_v37 = vpop.f32.mrb[0].mxu0 }
 0x227   : > { %v387_v38 = vadd.f32 %v567_v36, %v386_v37  ;;  %v599_v39 = vpop.f32.mrb[1].mxu0 }
 0x229   : > { %v390_v40 = vsub.f32 0.0, %v387_v38 }
 0x22b   : > { %v391_v41 = vmul.f32 1.442695, %v390_v40 }
 0x22d   : > { %681 = vpow2.f32 %v391_v41 }
 0x237   : > { %v682_v42 = vpop.eup %681 }
 0x238   : > { %v393_v43 = vadd.f32 1.0, %v682_v42 }
 0x23a   : > { %683 = vrcp.f32 %v393_v43 }
 0x244   : > { %v684_v44 = vpop.eup %683 }
 0x245   : > { %v395_v45 = vmul.f32 %v684_v44, %v387_v38 }
 0x247   : > { %617 = vmatmul.mubr.msk.f32.vlgmr.msra.gmra.mrb[0].mxu1 %vm411_vm2, %v395_v45 }
 0x31a   : > { %v481_v47 = vpop.f32.mrb[0].mxu1 }
 0x31b   : > { %v482_v48 = vadd.f32 %v569_v46, %v481_v47  ;;  %v618_v49 = vpop.f32.mrb[1].mxu1 }
 0x31d   : > { %485 = vst.msk [vmem:[%s269_s8] sm:$0xff] %vm277_vm0, %v482_v48 }
 0x31e   : > { %698 = shalt.err (!%p695_p3)
}
 0x31f   : > { %s699_s20 = scalar_lea.hbm %s902_s15, 128  ;;  %s703_s23 = scalar_lea.hbm %s952_s7, 256 }
 0x320   : > { %p700_p4 = scmp.ne.s32.totalorder %s902_s15, %s699_s20  ;;  %p704_p9 = scmp.lt.u32.totalorder %s902_s15, %s952_s7 }
 0x321   : > { %p705_p10 = scmp.lt.u32.totalorder %s703_s23, %s699_s20  ;;  %p707_p12 = scmp.lt.u32.totalorder %s699_s20, %s902_s15 }
 0x322   : > { %p701_p7 = pnand %p700_p4, %p831_p5 }
 0x323   : > { %p706_p11 = por %p705_p10, %p704_p9 }
 0x324   : > { %p702_p8 = pneg %p701_p7 }
 0x325   : > { %p708_p13 = por %p707_p12, %p706_p11 }
 0x327   : > { %p709_p0 = pnand %p708_p13, %p702_p8 }
 0x329   : > { %712 = shalt.err (!%p709_p0)
}
 0x32a   : > { %637 = dma.vmem_to_hbm [thread:$0]  (%p831_p5), %s904_s9, 128, %s902_s15, %s487_s16  }
 0x32b PF: > { %p643_p1 = scmp.ge.s32.totalorder %s747_s27, 2  ;;  %s512_s13 = sand.u32 1, %s735_s24  }
 0x32c   : > { %s513_s14 = scalar_lea.sflag [#allocation3], %s512_s13 }
 0x32d   : > { %p640_p2 = pnand %p643_p1, %p835_p6 }
 0x32f   : > { %730 = dma.done.wait (!%p640_p2), %s513_s14, 128  }
 0x330   : > { %732 = vsyncadd (!%p640_p2), %s513_s14, 4294967168  ;;  %p17_p3 = scmp.ge.s32.totalorder %s818_s30, 4   ;;  %s955_s24 = smov %s739_s25 }
 0x331   : > { %s956_s25 = smov %s743_s26  ;;  %s957_s26 = smov %s829_s10 }
 0x332   : > { %s958_s27 = smov %s818_s30  ;;  %19 = sbr.rel (!%p17_p3) target bundleno = 3 (0x3), region = 83 }
 0x339   :  { %518 = vsyncpa [#allocation3], 1 }
 0x33a   :  { %520 = vsyncpa [#allocation3 + $0x1], 1 }

</bundles_post_ra>
